<compile_context>
chip_gen: v6e
topology: v6e:2x2x1
jax: 0.10.0
libtpu: 0.0.40
codegen_flags: <defaults>
</compile_context>

<pallas_src>
import jax
import jax.numpy as jnp
import numpy as np
from jax.experimental import pallas as pl
from jax.experimental.pallas import tpu as pltpu


def _round_up(n, m):
    return ((n + m - 1) // m) * m


# --------------------------------------------------------------------------
# Kernel 1: conv1 + (fused) conv2-input construction.
# --------------------------------------------------------------------------
def bugcn_conv1_kernel(a_ref, x_ref, w1_ref, b1_ref, w2a_ref, w2b_ref,
                       xroot_ref, s_ref, h1_ref, c_ref, acc_ref):
    """grid=(row block i, contraction block k):
       h1 = A_hat @ (X @ W1) + b1, and at the last k also
       c  = relu(h1) @ W2a + S @ (relu(x_root) @ W2b)   (conv2 input)."""
    f32 = jnp.float32
    k = pl.program_id(1)

    @pl.when(k == 0)
    def _init():
        acc_ref[...] = jnp.zeros_like(acc_ref)

    # bf16 operands, f32 accumulation on the MXU.
    xw1 = jnp.dot(x_ref[...], w1_ref[...], preferred_element_type=f32)
    acc_ref[...] += jnp.dot(a_ref[...], xw1.astype(jnp.bfloat16),
                            preferred_element_type=f32)

    @pl.when(k == pl.num_programs(1) - 1)
    def _finalize():
        h1 = acc_ref[...] + b1_ref[...]                 # f32 epilogue
        h1_ref[...] = h1
        # W2b half acts on only B distinct rows (the graph roots).
        g = jnp.dot(jnp.maximum(xroot_ref[...], 0.0), w2b_ref[...],
                    preferred_element_type=f32)          # [B, O]
        c = (jnp.dot(jnp.maximum(h1, 0.0).astype(jnp.bfloat16), w2a_ref[...],
                     preferred_element_type=f32)
             + jnp.dot(s_ref[...], g, preferred_element_type=f32))
        # TODO(synk): F.dropout skipped -- module evaluated in eval mode.
        c_ref[...] = c.astype(jnp.bfloat16)


# --------------------------------------------------------------------------
# Kernel 2: conv2 + relu + scatter_mean + final concat (lane-dense store).
# --------------------------------------------------------------------------
def bugcn_conv2_kernel(a_ref, c_ref, b2_ref, m_ref, rooth1_ref, p1_ref, p2_ref,
                       out_ref, acc_ref, pool_ref):
    """h2 = relu(A_hat @ c + b2); pooled += M[:, i] @ h2; at the last grid
       step emit [pooled | h1[root] | 0] as ONE lane-dense [B, out_lanes]
       store via placement matmuls."""
    f32 = jnp.float32
    i = pl.program_id(0)
    k = pl.program_id(1)
    ni = pl.num_programs(0)
    nk = pl.num_programs(1)

    @pl.when((i == 0) & (k == 0))
    def _init_pool():
        pool_ref[...] = jnp.zeros_like(pool_ref)

    @pl.when(k == 0)
    def _init_acc():
        acc_ref[...] = jnp.zeros_like(acc_ref)

    acc_ref[...] += jnp.dot(a_ref[...], c_ref[...], preferred_element_type=f32)

    @pl.when(k == nk - 1)
    def _row_block_done():
        h2 = jnp.maximum(acc_ref[...] + b2_ref[...], 0.0)   # f32 epilogue
        pool_ref[...] += jnp.dot(m_ref[...], h2, preferred_element_type=f32)

    @pl.when((i == ni - 1) & (k == nk - 1))
    def _emit():
        out_ref[...] = (
            jnp.dot(pool_ref[...], p1_ref[...], preferred_element_type=f32)
            + jnp.dot(rooth1_ref[...], p2_ref[...], preferred_element_type=f32))


# --------------------------------------------------------------------------
# Plain-JAX glue.
# --------------------------------------------------------------------------
def build_adjacency(edge_index, n_nodes):
    """Dense A_hat = D^-1/2 (A + I) D^-1/2 with A[target, source] += 1."""
    src, dst = edge_index[0], edge_index[1]
    a = jnp.zeros((n_nodes, n_nodes), jnp.float32).at[dst, src].add(1.0)
    a = a + jnp.eye(n_nodes, dtype=jnp.float32)
    deg = a.sum(axis=1)
    dinv = jnp.where(deg > 0, jax.lax.rsqrt(deg), 0.0)
    return dinv[:, None] * a * dinv[None, :]


def bugcn_forward(x, edge_index, batch, root_index, params, *, tile=128):
    f32, bf16 = jnp.float32, jnp.bfloat16
    n_nodes, in_feats = x.shape
    w1, b1, w2, b2 = params["w1"], params["b1"], params["w2"], params["b2"]
    hid = w1.shape[1]
    out_feats = w2.shape[1]
    n_graphs = int(root_index.shape[0])

    n_pad = _round_up(n_nodes, tile)
    n_blk = n_pad // tile
    out_lanes = _round_up(out_feats + hid, 128)

    # Dense operators: only the O(N^2) adjacency remains (no r_mat).
    a_hat = build_adjacency(edge_index, n_nodes)
    sel = (batch[:, None] == jnp.arange(n_graphs)[None, :]).astype(f32)   # [N,B]
    mean_pool = (sel / jnp.maximum(sel.sum(axis=0), 1.0)[None, :]).T      # [B,N]

    def pad2(arr, rows, cols):
        return jnp.pad(arr, ((0, rows - arr.shape[0]), (0, cols - arr.shape[1])))

    a_hat_p = pad2(a_hat, n_pad, n_pad).astype(bf16)
    x_f32 = x.astype(f32)
    x_p = pad2(x_f32, n_pad, in_feats).astype(bf16)
    s_p = pad2(sel, n_pad, n_graphs)                      # f32 one-hot scatter
    m_p = pad2(mean_pool, n_graphs, n_pad)                # f32 mean-pool
    x_root = x_f32[root_index].astype(bf16)               # [B, Fin] row gather

    w1_b = w1.astype(bf16)
    w2a_b = w2[:hid].astype(bf16)                         # conv1-output half
    w2b_b = w2[hid:].astype(bf16)                         # root-feature half
    b1_2d = b1.reshape(1, hid).astype(f32)
    b2_2d = b2.reshape(1, out_feats).astype(f32)

    vmem_limit = 32 * 1024 * 1024   # explicit (v5e default is only 16 MiB)

    # ----------------- call 1: conv1 + conv2-input c -----------------
    cost1 = pl.CostEstimate(
        flops=2 * n_pad * n_pad * hid
              + 2 * n_pad * in_feats * hid * n_blk
              + 2 * n_pad * hid * out_feats,
        transcendentals=0,
        bytes_accessed=2 * n_pad * n_pad + 2 * n_pad * in_feats
                       + 4 * n_pad * hid + 2 * n_pad * out_feats)
    h1, c = pl.pallas_call(
        bugcn_conv1_kernel,
        out_shape=(jax.ShapeDtypeStruct((n_pad, hid), f32),
                   jax.ShapeDtypeStruct((n_pad, out_feats), bf16)),
        grid=(n_blk, n_blk),
        in_specs=[
            pl.BlockSpec((tile, tile), lambda i, k: (i, k)),          # A_hat
            pl.BlockSpec((tile, in_feats), lambda i, k: (k, 0)),      # X
            pl.BlockSpec((in_feats, hid), lambda i, k: (0, 0)),       # W1
            pl.BlockSpec((1, hid), lambda i, k: (0, 0)),              # b1
            pl.BlockSpec((hid, out_feats), lambda i, k: (0, 0)),      # W2a
            pl.BlockSpec((in_feats, out_feats), lambda i, k: (0, 0)), # W2b
            pl.BlockSpec((n_graphs, in_feats), lambda i, k: (0, 0)),  # x_root
            pl.BlockSpec((tile, n_graphs), lambda i, k: (i, 0)),      # S
        ],
        out_specs=(pl.BlockSpec((tile, hid), lambda i, k: (i, 0)),
                   pl.BlockSpec((tile, out_feats), lambda i, k: (i, 0))),
        scratch_shapes=[pltpu.VMEM((tile, hid), f32)],
        compiler_params=pltpu.CompilerParams(
            dimension_semantics=("parallel", "arbitrary"),  # rows -> v7x 2 TCs
            vmem_limit_bytes=vmem_limit),
        cost_estimate=cost1,
    )(a_hat_p, x_p, w1_b, b1_2d, w2a_b, w2b_b, x_root, s_p)

    # root_extend #2 collapses under mean-pool: M @ (R @ h1) == h1[root_index].
    root_h1 = h1[root_index]                               # [B, hid] row gather

    # Placement matrices -> one lane-dense store of [pooled | root_h1 | 0].
    p1 = jnp.eye(out_feats, out_lanes, dtype=f32)
    p2 = jnp.eye(hid, out_lanes, k=out_feats, dtype=f32)

    # --------- call 2: conv2 + relu + scatter_mean + concat ---------
    cost2 = pl.CostEstimate(
        flops=2 * n_pad * n_pad * out_feats + 2 * n_pad * n_graphs * out_feats,
        transcendentals=0,
        bytes_accessed=2 * n_pad * n_pad + 2 * n_pad * out_feats
                       + 4 * n_graphs * (n_pad + out_lanes))
    out_pad = pl.pallas_call(
        bugcn_conv2_kernel,
        out_shape=jax.ShapeDtypeStruct((n_graphs, out_lanes), f32),
        grid=(n_blk, n_blk),
        in_specs=[
            pl.BlockSpec((tile, tile), lambda i, k: (i, k)),           # A_hat
            pl.BlockSpec((tile, out_feats), lambda i, k: (k, 0)),      # c
            pl.BlockSpec((1, out_feats), lambda i, k: (0, 0)),         # b2
            pl.BlockSpec((n_graphs, tile), lambda i, k: (0, i)),       # M
            pl.BlockSpec((n_graphs, hid), lambda i, k: (0, 0)),        # h1[root]
            pl.BlockSpec((out_feats, out_lanes), lambda i, k: (0, 0)), # P1
            pl.BlockSpec((hid, out_lanes), lambda i, k: (0, 0)),       # P2
        ],
        out_specs=pl.BlockSpec((n_graphs, out_lanes), lambda i, k: (0, 0)),
        scratch_shapes=[pltpu.VMEM((tile, out_feats), f32),
                        pltpu.VMEM((n_graphs, out_feats), f32)],
        compiler_params=pltpu.CompilerParams(
            # pooled output accumulates across row blocks -> keep sequential.
            dimension_semantics=("arbitrary", "arbitrary"),
            vmem_limit_bytes=vmem_limit),
        cost_estimate=cost2,
    )(a_hat_p, c, b2_2d, m_p, root_h1, p1, p2)

    return out_pad[:, :out_feats + hid]


def bugcn_reference(x, edge_index, batch, root_index, params):
    """Pure-JAX f32 reference mirroring the PyTorch forward (eval mode)."""
    w1, b1, w2, b2 = params["w1"], params["b1"], params["w2"], params["b2"]
    n_graphs = int(root_index.shape[0])
    a_hat = build_adjacency(edge_index, x.shape[0])
    x = x.astype(jnp.float32)
    h1 = a_hat @ (x @ w1) + b1
    root1 = x[root_index][batch]
    cat1 = jnp.maximum(jnp.concatenate([h1, root1], axis=1), 0.0)
    h2 = jnp.maximum(a_hat @ (cat1 @ w2) + b2, 0.0)
    root2 = h1[root_index][batch]
    cat2 = jnp.concatenate([h2, root2], axis=1)
    sel = (batch[None, :] == jnp.arange(n_graphs)[:, None]).astype(jnp.float32)
    m = sel / jnp.maximum(sel.sum(axis=1, keepdims=True), 1.0)
    return m @ cat2


if __name__ == "__main__":
    in_feats, hid_feats, out_feats = 8, 16, 8

    # Four bottom-up trees (child -> parent edges), 300 nodes total, so the
    # padded grid is a real (3, 3) block grid exercising accumulation/padding.
    sizes = [96, 80, 70, 54]
    batch_l, src_l, dst_l, roots = [], [], [], []
    off = 0
    for g, sz in enumerate(sizes):
        roots.append(off)
        batch_l.extend([g] * sz)
        for j in range(1, sz):
            src_l.append(off + j)                # child (source of BU edge)
            dst_l.append(off + (j - 1) // 2)     # parent (target)
        off += sz
    n_nodes = off
    batch = jnp.asarray(batch_l, jnp.int32)
    root_index = jnp.asarray(roots, jnp.int32)
    edge_index = jnp.asarray(np.stack([src_l, dst_l]).astype(np.int32))

    key = jax.random.PRNGKey(0)
    k1, k2, k3, k4, k5 = jax.random.split(key, 5)
    x = jax.random.normal(k1, (n_nodes, in_feats), jnp.float32)
    params = {
        "w1": 0.1 * jax.random.normal(k2, (in_feats, hid_feats), jnp.float32),
        "b1": 0.1 * jax.random.normal(k4, (hid_feats,), jnp.float32),
        "w2": 0.1 * jax.random.normal(
            k3, (hid_feats + in_feats, out_feats), jnp.float32),
        "b2": 0.1 * jax.random.normal(k5, (out_feats,), jnp.float32),
    }

    out = jax.block_until_ready(
        bugcn_forward(x, edge_index, batch, root_index, params))
    ref = bugcn_reference(x, edge_index, batch, root_index, params)
    # bf16 operands (f32 accumulate) vs an all-f32 reference -> loose-ish tol.
    np.testing.assert_allclose(np.asarray(out), np.asarray(ref),
                               rtol=5e-2, atol=3e-2)
    print("KERNEL_OK")
</pallas_src>

<mosaic_0001>
module attributes {stable_mosaic.version = 11 : i64} {
  func.func @bugcn_conv1_kernel(%arg0: i32, %arg1: i32, %arg2: memref<128x128xbf16, #tpu.memory_space<vmem>>, %arg3: memref<128x8xbf16, #tpu.memory_space<vmem>>, %arg4: memref<8x16xbf16, #tpu.memory_space<vmem>>, %arg5: memref<1x16xf32, #tpu.memory_space<vmem>>, %arg6: memref<16x8xbf16, #tpu.memory_space<vmem>>, %arg7: memref<8x8xbf16, #tpu.memory_space<vmem>>, %arg8: memref<4x8xbf16, #tpu.memory_space<vmem>>, %arg9: memref<128x4xf32, #tpu.memory_space<vmem>>, %arg10: memref<128x16xf32, #tpu.memory_space<vmem>>, %arg11: memref<128x8xbf16, #tpu.memory_space<vmem>>, %arg12: memref<128x16xf32, #tpu.memory_space<vmem>>) attributes {dimension_semantics = [#tpu.dimension_semantics<parallel>, #tpu.dimension_semantics<arbitrary>], iteration_bounds = array<i64: 3, 3>, scalar_prefetch = 0 : i64, scratch_operands = 1 : i64, tpu.core_type = #tpu.core_type<tc>, window_params = [{transform_indices = @transform_0, window_bounds = array<i64: 128, 128>}, {transform_indices = @transform_1, window_bounds = array<i64: 128, 8>}, {pipeline_mode = #tpu.pipeline_mode<synchronous>, transform_indices = @transform_2, window_bounds = array<i64: 8, 16>}, {pipeline_mode = #tpu.pipeline_mode<synchronous>, transform_indices = @transform_3, window_bounds = array<i64: 1, 16>}, {pipeline_mode = #tpu.pipeline_mode<synchronous>, transform_indices = @transform_4, window_bounds = array<i64: 16, 8>}, {pipeline_mode = #tpu.pipeline_mode<synchronous>, transform_indices = @transform_5, window_bounds = array<i64: 8, 8>}, {pipeline_mode = #tpu.pipeline_mode<synchronous>, transform_indices = @transform_6, window_bounds = array<i64: 4, 8>}, {transform_indices = @transform_7, window_bounds = array<i64: 128, 4>}, {transform_indices = @transform_8, window_bounds = array<i64: 128, 16>}, {transform_indices = @transform_9, window_bounds = array<i64: 128, 8>}]} {
    %c0_i32 = arith.constant 0 : i32
    %0 = arith.cmpi eq, %arg1, %c0_i32 : i32
    %1 = arith.extui %0 : i1 to i32
    %c0_i32_0 = arith.constant 0 : i32
    %2 = arith.cmpi ne, %1, %c0_i32_0 : i32
    scf.if %2 {
      %cst_12 = arith.constant 0.000000e+00 : f32
      %15 = vector.broadcast %cst_12 : f32 to vector<128x16xf32>
      %c0_13 = arith.constant 0 : index
      %c0_14 = arith.constant 0 : index
      %16 = vector.load %arg12[%c0_13, %c0_14] : memref<128x16xf32, #tpu.memory_space<vmem>>, vector<128x16xf32>
      tpu.vector_store %arg12[%c0_13, %c0_14], %15 {strides = array<i32>} : memref<128x16xf32, #tpu.memory_space<vmem>>, vector<128x16xf32>,
    } else {
    }
    %c0 = arith.constant 0 : index
    %c0_1 = arith.constant 0 : index
    %3 = vector.load %arg3[%c0, %c0_1] : memref<128x8xbf16, #tpu.memory_space<vmem>>, vector<128x8xbf16>
    %c0_2 = arith.constant 0 : index
    %c0_3 = arith.constant 0 : index
    %4 = vector.load %arg4[%c0_2, %c0_3] : memref<8x16xbf16, #tpu.memory_space<vmem>>, vector<8x16xbf16>
    %cst = arith.constant dense<0.000000e+00> : vector<128x16xf32>
    %5 = tpu.matmul %3, %4, %cst {dimension_numbers = #tpu.dot_dimension_numbers<[1], [0], [0], [1], [0, 0, 1, 1], [], []>} : vector<128x8xbf16>, vector<8x16xbf16>, vector<128x16xf32> -> vector<128x16xf32>
    %c0_4 = arith.constant 0 : index
    %c0_5 = arith.constant 0 : index
    %6 = vector.load %arg12[%c0_4, %c0_5] : memref<128x16xf32, #tpu.memory_space<vmem>>, vector<128x16xf32>
    %c0_6 = arith.constant 0 : index
    %c0_7 = arith.constant 0 : index
    %7 = vector.load %arg2[%c0_6, %c0_7] : memref<128x128xbf16, #tpu.memory_space<vmem>>, vector<128x128xbf16>
    %8 = arith.truncf %5 : vector<128x16xf32> to vector<128x16xbf16>
    %cst_8 = arith.constant dense<0.000000e+00> : vector<128x16xf32>
    %9 = tpu.matmul %7, %8, %cst_8 {dimension_numbers = #tpu.dot_dimension_numbers<[1], [0], [0], [1], [0, 0, 1, 1], [], []>} : vector<128x128xbf16>, vector<128x16xbf16>, vector<128x16xf32> -> vector<128x16xf32>
    %10 = arith.addf %6, %9 : vector<128x16xf32>
    %c0_9 = arith.constant 0 : index
    %c0_10 = arith.constant 0 : index
    %11 = vector.load %arg12[%c0_9, %c0_10] : memref<128x16xf32, #tpu.memory_space<vmem>>, vector<128x16xf32>
    tpu.vector_store %arg12[%c0_9, %c0_10], %10 {strides = array<i32>} : memref<128x16xf32, #tpu.memory_space<vmem>>, vector<128x16xf32>,
    %c2_i32 = arith.constant 2 : i32
    %12 = arith.cmpi eq, %arg1, %c2_i32 : i32
    %13 = arith.extui %12 : i1 to i32
    %c0_i32_11 = arith.constant 0 : i32
    %14 = arith.cmpi ne, %13, %c0_i32_11 : i32
    scf.if %14 {
      %c0_12 = arith.constant 0 : index
      %c0_13 = arith.constant 0 : index
      %15 = vector.load %arg12[%c0_12, %c0_13] : memref<128x16xf32, #tpu.memory_space<vmem>>, vector<128x16xf32>
      %c0_14 = arith.constant 0 : index
      %c0_15 = arith.constant 0 : index
      %16 = vector.load %arg5[%c0_14, %c0_15] : memref<1x16xf32, #tpu.memory_space<vmem>>, vector<1x16xf32>
      %17 = vector.broadcast %16 : vector<1x16xf32> to vector<128x16xf32>
      %18 = arith.addf %15, %17 : vector<128x16xf32>
      %c0_16 = arith.constant 0 : index
      %c0_17 = arith.constant 0 : index
      %19 = vector.load %arg10[%c0_16, %c0_17] : memref<128x16xf32, #tpu.memory_space<vmem>>, vector<128x16xf32>
      tpu.vector_store %arg10[%c0_16, %c0_17], %18 {strides = array<i32>} : memref<128x16xf32, #tpu.memory_space<vmem>>, vector<128x16xf32>,
      %c0_18 = arith.constant 0 : index
      %c0_19 = arith.constant 0 : index
      %20 = vector.load %arg8[%c0_18, %c0_19] : memref<4x8xbf16, #tpu.memory_space<vmem>>, vector<4x8xbf16>
      %cst_20 = arith.constant 0.000000e+00 : bf16
      %21 = vector.broadcast %cst_20 : bf16 to vector<4x8xbf16>
      %22 = arith.maximumf %20, %21 : vector<4x8xbf16>
      %c0_21 = arith.constant 0 : index
      %c0_22 = arith.constant 0 : index
      %23 = vector.load %arg7[%c0_21, %c0_22] : memref<8x8xbf16, #tpu.memory_space<vmem>>, vector<8x8xbf16>
      %cst_23 = arith.constant dense<0.000000e+00> : vector<4x8xf32>
      %24 = tpu.matmul %22, %23, %cst_23 {dimension_numbers = #tpu.dot_dimension_numbers<[1], [0], [0], [1], [0, 0, 1, 1], [], []>} : vector<4x8xbf16>, vector<8x8xbf16>, vector<4x8xf32> -> vector<4x8xf32>
      %cst_24 = arith.constant 0.000000e+00 : f32
      %25 = vector.broadcast %cst_24 : f32 to vector<128x16xf32>
      %26 = arith.maximumf %18, %25 : vector<128x16xf32>
      %27 = arith.truncf %26 : vector<128x16xf32> to vector<128x16xbf16>
      %c0_25 = arith.constant 0 : index
      %c0_26 = arith.constant 0 : index
      %28 = vector.load %arg6[%c0_25, %c0_26] : memref<16x8xbf16, #tpu.memory_space<vmem>>, vector<16x8xbf16>
      %cst_27 = arith.constant dense<0.000000e+00> : vector<128x8xf32>
      %29 = tpu.matmul %27, %28, %cst_27 {dimension_numbers = #tpu.dot_dimension_numbers<[1], [0], [0], [1], [0, 0, 1, 1], [], []>} : vector<128x16xbf16>, vector<16x8xbf16>, vector<128x8xf32> -> vector<128x8xf32>
      %c0_28 = arith.constant 0 : index
      %c0_29 = arith.constant 0 : index
      %30 = vector.load %arg9[%c0_28, %c0_29] : memref<128x4xf32, #tpu.memory_space<vmem>>, vector<128x4xf32>
      %cst_30 = arith.constant dense<0.000000e+00> : vector<128x8xf32>
      %31 = tpu.matmul %30, %24, %cst_30 {dimension_numbers = #tpu.dot_dimension_numbers<[1], [0], [0], [1], [0, 0, 1, 1], [], []>} : vector<128x4xf32>, vector<4x8xf32>, vector<128x8xf32> -> vector<128x8xf32>
      %32 = arith.addf %29, %31 : vector<128x8xf32>
      %33 = arith.truncf %32 : vector<128x8xf32> to vector<128x8xbf16>
      %c0_31 = arith.constant 0 : index
      %c0_32 = arith.constant 0 : index
      %34 = vector.load %arg11[%c0_31, %c0_32] : memref<128x8xbf16, #tpu.memory_space<vmem>>, vector<128x8xbf16>
      tpu.vector_store %arg11[%c0_31, %c0_32], %33 {strides = array<i32>} : memref<128x8xbf16, #tpu.memory_space<vmem>>, vector<128x8xbf16>,
    } else {
    }
    return
  }
  func.func @transform_0(%arg0: i32, %arg1: i32) -> (i32, i32) {
    %c0_i32 = arith.constant 0 : i32
    return %arg0, %arg1 : i32, i32
  }
  func.func @transform_1(%arg0: i32, %arg1: i32) -> (i32, i32) {
    %c0_i32 = arith.constant 0 : i32
    %c0_i32_0 = arith.constant 0 : i32
    return %arg1, %c0_i32 : i32, i32
  }
  func.func @transform_2(%arg0: i32, %arg1: i32) -> (i32, i32) {
    %c0_i32 = arith.constant 0 : i32
    %c0_i32_0 = arith.constant 0 : i32
    %c0_i32_1 = arith.constant 0 : i32
    return %c0_i32, %c0_i32_0 : i32, i32
  }
  func.func @transform_3(%arg0: i32, %arg1: i32) -> (i32, i32) {
    %c0_i32 = arith.constant 0 : i32
    %c0_i32_0 = arith.constant 0 : i32
    %c0_i32_1 = arith.constant 0 : i32
    return %c0_i32, %c0_i32_0 : i32, i32
  }
  func.func @transform_4(%arg0: i32, %arg1: i32) -> (i32, i32) {
    %c0_i32 = arith.constant 0 : i32
    %c0_i32_0 = arith.constant 0 : i32
    %c0_i32_1 = arith.constant 0 : i32
    return %c0_i32, %c0_i32_0 : i32, i32
  }
  func.func @transform_5(%arg0: i32, %arg1: i32) -> (i32, i32) {
    %c0_i32 = arith.constant 0 : i32
    %c0_i32_0 = arith.constant 0 : i32
    %c0_i32_1 = arith.constant 0 : i32
    return %c0_i32, %c0_i32_0 : i32, i32
  }
  func.func @transform_6(%arg0: i32, %arg1: i32) -> (i32, i32) {
    %c0_i32 = arith.constant 0 : i32
    %c0_i32_0 = arith.constant 0 : i32
    %c0_i32_1 = arith.constant 0 : i32
    return %c0_i32, %c0_i32_0 : i32, i32
  }
  func.func @transform_7(%arg0: i32, %arg1: i32) -> (i32, i32) {
    %c0_i32 = arith.constant 0 : i32
    %c0_i32_0 = arith.constant 0 : i32
    return %arg0, %c0_i32 : i32, i32
  }
  func.func @transform_8(%arg0: i32, %arg1: i32) -> (i32, i32) {
    %c0_i32 = arith.constant 0 : i32
    %c0_i32_0 = arith.constant 0 : i32
    return %arg0, %c0_i32 : i32, i32
  }
  func.func @transform_9(%arg0: i32, %arg1: i32) -> (i32, i32) {
    %c0_i32 = arith.constant 0 : i32
    %c0_i32_0 = arith.constant 0 : i32
    return %arg0, %c0_i32 : i32, i32
  }
}

</mosaic_0001>

<bundles_post_ra>
// kernel: tpu_custom_call.1
= control target key start
LH: loop header
LB: loop body
LE: loop exit
PB: predicated region body
PF: predicated region fallthrough
CT: control target
= control target key end

     0   :  { %s2416_s0 = inlined_call_operand.vmem [shape: bf16[384,384], index: 0, kind: input, shape index: {}]   ;;  %s2417_s1 = inlined_call_operand.vmem [shape: bf16[384,8], index: 1, kind: input, shape index: {}]   ;;  %s2418_s2 = inlined_call_operand.vmem [shape: bf16[8,16], index: 2, kind: input, shape index: {}]   ;;  %s2419_s3 = inlined_call_operand.vmem [shape: f32[1,16], index: 3, kind: input, shape index: {}]   ;;  %s2420_s4 = inlined_call_operand.vmem [shape: bf16[16,8], index: 4, kind: input, shape index: {}]   ;;  %s2421_s5 = inlined_call_operand.vmem [shape: bf16[8,8], index: 5, kind: input, shape index: {}]   ;;  %s2422_s6 = inlined_call_operand.vmem [shape: bf16[4,8], index: 6, kind: input, shape index: {}]   ;;  %s2423_s7 = inlined_call_operand.vmem [shape: f32[384,4], index: 7, kind: input, shape index: {}]   ;;  %s2424_s8 = inlined_call_operand.vmem [shape: f32[384,16], index: 8, kind: output, shape index: {0}]   ;;  %s2425_s9 = inlined_call_operand.vmem [shape: bf16[384,8], index: 9, kind: output, shape index: {1}]  }
   0x1   :  { %2429 = sst [smem:[#allocation7_spill]] %s2416_s0 }
   0x2   :  { %s2089_s30 = smov 0   ;;  %s2091_s10 = smov 0  }
   0x3   :  { %s2093_s11 = smov 0   ;;  %s2095_s12 = smov 0  }
   0x4   :  { %s2097_s13 = smov 0   ;;  %s2099_s14 = smov 0  }
   0x5   :  { %s2101_s15 = smov 0  }
   0x6 LB: > { %2430 = sst [smem:[#allocation4_spill]] %s2029_s14  ;;  %s29_s16 = sadd.s32 1, %s2025_s13  ;;  %s2033_s15 = sphi %s2101_s15, %s20_s15   ;;  %s2029_s14 = sphi %s2099_s14, %s2436_s14   ;;  %s2025_s13 = sphi %s2097_s13, %s2440_s13   ;;  %s2021_s12 = sphi %s2095_s12, %s2434_s12   ;;  %s2017_s11 = sphi %s2093_s11, %s2439_s11   ;;  %s2013_s10 = sphi %s2091_s10, %s2438_s10   ;;  %s2009_s30 = sphi %s2089_s30, %s2437_s30  }
   0x7   : > { %p30_p0 = scmp.ge.s32.totalorder %s29_s16, 3  ;;  %s32_s17 = sadd.s32 1, %s2029_s14 }
   0x8   : > { %p48_p1 = scmp.ne.s32.totalorder %s2013_s10, %s2009_s30  ;;  %p49_p2 = scmp.eq.s32.totalorder %s2033_s15, 0 }
   0x9   : > { %s2442_s16 = smov (%p30_p0, %s29_s16), 0  ;;  %s2444_s17 = smov (!%p30_p0, %s32_s17), %s2029_s14 }
   0xa   : > { %2431 = sst [smem:[#allocation5_spill]] %s2442_s16  ;;  %p50_p3 = por %p49_p2, %p48_p1 }
   0xb   : > { %p34_p4 = scmp.ge.s32.totalorder %s2444_s17, 3  ;;  %s37_s18 = ssub.s32 %s2025_s13, %s2442_s16 }
   0xc   : > { %s41_s21 = sadd.s32 1, %s2013_s10  ;;  %p1628_p6 = scmp.ge.s32.totalorder %s2033_s15, 9 }
   0xd   : > { %s2446_s17 = smov (%p34_p4, %s2444_s17), 0 }
   0xe   : > { %2432 = sst [smem:[#allocation6_spill]] %s2446_s17  ;;  %s36_s19 = ssub.s32 %s2029_s14, %s2446_s17 }
   0xf   : > { %s38_s20 = sor.u32 %s37_s18, %s36_s19  ;;  %298 = sbr.rel (%p1628_p6) target bundleno = 40 (0x28), region = 36 }
  0x10   : > { %p39_p5 = scmp.eq.s32.totalorder %s38_s20, 0 }
  0x12   : > { %s2140_s22 = scalar_select %p39_p5, %s2013_s10, %s41_s21  }
  0x14   : > { %301 = sbr.rel (!%p50_p3) target bundleno = 40 (0x28), region = 40  ;;  %s303_s23 = sand.u32 (%p50_p3), 1, %s2013_s10  }
  0x15   : > { %s1901_s24 = smul.u32 (%p50_p3), 48, %s2029_s14  ;;  %s1629_s25 = sshll.u32 (%p50_p3), %s303_s23, 6 }
  0x16   : > { %s2433_s0 = sld [smem:[#allocation7_spill]] (%p50_p3)  ;;  %s305_s19 = scalar_lea.vmem (%p50_p3), [#allocation3], %s1629_s25 }
  0x17   : > { %s308_s26 = sadd.s32 (%p50_p3), %s2025_s13, %s1901_s24 }
  0x18   : > { %s1632_s27 = sshll.u32 (%p50_p3), %s308_s26, 2 }
  0x1c   : > { %s2149_s18 = scalar_lea.vmem %s2433_s0, %s1632_s27 }
  0x1d   : > { %v327_v0 = vld [vmem:[%s2149_s18] sm:$0xf]  ;;  %v329_v1 = vld [vmem:[%s2149_s18 + $0xc] sm:$0xf]  ;;  %v331_v2 = vld [vmem:[%s2149_s18 + $0x18] sm:$0xf] }
  0x1e   : > { %328 = vst [vmem:[%s305_s19] sm:$0xf] %v327_v0  ;;  %330 = vst [vmem:[%s305_s19 + $0x4] sm:$0xf] %v329_v1  ;;  %v333_v3 = vld [vmem:[%s2149_s18 + $0x24] sm:$0xf] }
  0x1f   : > { %332 = vst [vmem:[%s305_s19 + $0x8] sm:$0xf] %v331_v2  ;;  %v335_v4 = vld [vmem:[%s2149_s18 + $0x30] sm:$0xf]  ;;  %v337_v5 = vld [vmem:[%s2149_s18 + $0x3c] sm:$0xf] }
  0x20   : > { %334 = vst [vmem:[%s305_s19 + $0xc] sm:$0xf] %v333_v3  ;;  %336 = vst [vmem:[%s305_s19 + $0x10] sm:$0xf] %v335_v4  ;;  %v339_v6 = vld [vmem:[%s2149_s18 + $0x48] sm:$0xf] }
  0x21   : > { %338 = vst [vmem:[%s305_s19 + $0x14] sm:$0xf] %v337_v5  ;;  %v341_v7 = vld [vmem:[%s2149_s18 + $0x54] sm:$0xf]  ;;  %v343_v8 = vld [vmem:[%s2149_s18 + $0x60] sm:$0xf] }
  0x22   : > { %340 = vst [vmem:[%s305_s19 + $0x18] sm:$0xf] %v339_v6  ;;  %342 = vst [vmem:[%s305_s19 + $0x1c] sm:$0xf] %v341_v7  ;;  %v345_v9 = vld [vmem:[%s2149_s18 + $0x6c] sm:$0xf] }
  0x23   : > { %344 = vst [vmem:[%s305_s19 + $0x20] sm:$0xf] %v343_v8  ;;  %v347_v10 = vld [vmem:[%s2149_s18 + $0x78] sm:$0xf]  ;;  %v349_v11 = vld [vmem:[%s2149_s18 + $0x84] sm:$0xf] }
  0x24   : > { %346 = vst [vmem:[%s305_s19 + $0x24] sm:$0xf] %v345_v9  ;;  %348 = vst [vmem:[%s305_s19 + $0x28] sm:$0xf] %v347_v10  ;;  %v351_v12 = vld [vmem:[%s2149_s18 + $0x90] sm:$0xf] }
  0x25   : > { %350 = vst [vmem:[%s305_s19 + $0x2c] sm:$0xf] %v349_v11  ;;  %v353_v13 = vld [vmem:[%s2149_s18 + $0x9c] sm:$0xf]  ;;  %v355_v14 = vld [vmem:[%s2149_s18 + $0xa8] sm:$0xf] }
  0x26   : > { %352 = vst [vmem:[%s305_s19 + $0x30] sm:$0xf] %v351_v12  ;;  %354 = vst [vmem:[%s305_s19 + $0x34] sm:$0xf] %v353_v13  ;;  %v357_v15 = vld [vmem:[%s2149_s18 + $0xb4] sm:$0xf] }
  0x27   : > { %356 = vst [vmem:[%s305_s19 + $0x38] sm:$0xf] %v355_v14  ;;  %358 = vst [vmem:[%s305_s19 + $0x3c] sm:$0xf] %v357_v15 }
  0x28 PF: > { %p1633_p7 = scmp.ge.s32.totalorder %s2033_s15, 1  ;;  %p431_p8 = scmp.lt.s32.totalorder %s2033_s15, 10 }
  0x2a   : > { %p432_p9 = pnand %p1633_p7, %p431_p8 }
  0x2b   : > { %s438_s20 = sand.u32 (!%p432_p9), 1, %s2009_s30   ;;  %s1635_s21 = sshll.u32 (!%p432_p9), %s2017_s11, 4 }
  0x2c   : > { %435 = sbr.rel (%p432_p9) target bundleno = 974 (0x3ce), region = 89  ;;  %s1634_s23 = sshll.u32 (!%p432_p9), %s438_s20, 6 }
  0x2d   : > { %p490_p10 = scmp.lt.s32.totalorder (!%p432_p9), %s1635_s21, 47  ;;  %s1637_s24 = sshll.u32 (!%p432_p9), %s2021_s12, 4 }
  0x2e   : > { %p496_p11 = scmp.lt.s32.totalorder (!%p432_p9), %s1637_s24, 47  ;;  %p1643_p12 = scmp.ne.s32.totalorder (!%p432_p9), %s2017_s11, 0 }
  0x31   : > { %s2448_s21 = smov (!%p490_p10, %s1635_s21), 47  ;;  %s2450_s24 = smov (!%p496_p11, %s1637_s24), 47 }
  0x32   : > { %s1636_s25 = sshll.u32 %s2448_s21, 2  ;;  %s1638_s29 = sshll.u32 %s2450_s24, 3 }
  0x33   : > { %s2175_s28 = scalar_lea.vmem %s2417_s1, %s1636_s25  ;;  %s1642_s18 = sshll.u32 %s2450_s24, 2 }
  0x34   : > { %s2180_s17 = scalar_lea.vmem %s2423_s7, %s1638_s29  ;;  %s2185_s12 = scalar_lea.vmem %s2424_s8, %s1638_s29 }
  0x35   : > { %s2190_s14 = scalar_lea.vmem %s2425_s9, %s1642_s18  ;;  %s2192_s25 = scalar_lea.vmem [#allocation3], %s1634_s23 }
  0x36   : > { %517 = sbr.rel (%p1643_p12) target bundleno = 68 (0x44), region = 97 }
  0x3b   : > { %vm518_vm0 = vcmask 130048   ;;  %v2035_v16 = vmov 0.0  }
  0x3c   : > { %519 = vst.msk [vmem:[#allocation2] sm:$0xff] %vm518_vm0, %v2035_v16  ;;  %520 = vst.msk [vmem:[#allocation2 + $0x8] sm:$0xff] %vm518_vm0, %v2035_v16 }
  0x3d   : > { %521 = vst.msk [vmem:[#allocation2 + $0x10] sm:$0xff] %vm518_vm0, %v2035_v16  ;;  %522 = vst.msk [vmem:[#allocation2 + $0x18] sm:$0xff] %vm518_vm0, %v2035_v16 }
  0x3e   : > { %523 = vst.msk [vmem:[#allocation2 + $0x20] sm:$0xff] %vm518_vm0, %v2035_v16  ;;  %524 = vst.msk [vmem:[#allocation2 + $0x28] sm:$0xff] %vm518_vm0, %v2035_v16 }
  0x3f   : > { %525 = vst.msk [vmem:[#allocation2 + $0x30] sm:$0xff] %vm518_vm0, %v2035_v16  ;;  %526 = vst.msk [vmem:[#allocation2 + $0x38] sm:$0xff] %vm518_vm0, %v2035_v16 }
  0x40   : > { %527 = vst.msk [vmem:[#allocation2 + $0x40] sm:$0xff] %vm518_vm0, %v2035_v16  ;;  %528 = vst.msk [vmem:[#allocation2 + $0x48] sm:$0xff] %vm518_vm0, %v2035_v16 }
  0x41   : > { %529 = vst.msk [vmem:[#allocation2 + $0x50] sm:$0xff] %vm518_vm0, %v2035_v16  ;;  %530 = vst.msk [vmem:[#allocation2 + $0x58] sm:$0xff] %vm518_vm0, %v2035_v16 }
  0x42   : > { %531 = vst.msk [vmem:[#allocation2 + $0x60] sm:$0xff] %vm518_vm0, %v2035_v16  ;;  %532 = vst.msk [vmem:[#allocation2 + $0x68] sm:$0xff] %vm518_vm0, %v2035_v16 }
  0x43   : > { %533 = vst.msk [vmem:[#allocation2 + $0x70] sm:$0xff] %vm518_vm0, %v2035_v16  ;;  %534 = vst.msk [vmem:[#allocation2 + $0x78] sm:$0xff] %vm518_vm0, %v2035_v16 }
  0x44 PF: > { %v551_v17 = vld [vmem:[%s2418_s2] sm:$0xf]  ;;  %vm617_vm1 = vcmask 1043456   ;;  %vm592_vm2 = vcmask 64512   ;;  %v1963_v20 = vld [vmem:[%s2175_s28 + $0x8] sm:$0xff]   ;;  %v1964_v21 = vld [vmem:[%s2175_s28 + $0x10] sm:$0xff]  }
  0x45   : > { %v1962_v18 = vld [vmem:[%s2175_s28] sm:$0xff]   ;;  %1900 = vmatprep.subr.msk.bf16.mxu0 %vm617_vm1, %v551_v17  ;;  %v619_v19 = vsel %vm617_vm1, %v551_v17, 0  ;;  %v1965_v22 = vld [vmem:[%s2175_s28 + $0x18] sm:$0xff]   ;;  %v1967_v24 = vld [vmem:[%s2175_s28 + $0x28] sm:$0xff]   ;;  %vm919_vm3 = vcmask 130048   ;;  %p1668_p13 = scmp.ne.s32.totalorder %s2017_s11, 2 }
  0x46   : > { %1785 = vmatpush3.bf16.msra.mxu0 %v619_v19  ;;  %1786 = vmatprep.mubr.msk.bf16.mxu0 %vm592_vm2, %v1962_v18  ;;  %v1966_v23 = vld [vmem:[%s2175_s28 + $0x20] sm:$0xff]   ;;  %v1968_v25 = vld [vmem:[%s2175_s28 + $0x30] sm:$0xff]   ;;  %v1969_v26 = vld [vmem:[%s2175_s28 + $0x38] sm:$0xff]  }
  0x47   : > { %v1970_v27 = vld [vmem:[%s2192_s25 + $0x10] sm:$0xff]   ;;  %v1974_v28 = vld [vmem:[%s2192_s25] sm:$0xff]   ;;  %v1971_v53 = vld [vmem:[%s2192_s25 + $0x18] sm:$0xff]  }
  0x48   : > { %1822 = vmatprep.mubr.bf16.mxu1 %v1970_v27  ;;  %v1975_v54 = vld [vmem:[%s2192_s25 + $0x8] sm:$0xff]   ;;  %v1972_v55 = vld [vmem:[%s2192_s25 + $0x20] sm:$0xff]   ;;  %v1976_v57 = vld [vmem:[%s2192_s25 + $0x30] sm:$0xff]  }
  0x49   : > { %1787 = vmatmul.mubr.msk.bf16.vlgmr.msra.gmra.mxu0 %vm592_vm2, %v1963_v20  ;;  %v1973_v56 = vld [vmem:[%s2192_s25 + $0x28] sm:$0xff]   ;;  %v1977_v58 = vld [vmem:[%s2192_s25 + $0x38] sm:$0xff]   ;;  %v724_v59 = vld [vmem:[#allocation2 + $0x30] sm:$0xff] }
  0x4a   : > { %1790 = vmatprep.mubr.msk.bf16.mxu0 %vm592_vm2, %v1964_v21  ;;  %v720_v60 = vld [vmem:[#allocation2 + $0x10] sm:$0xff]  ;;  %v722_v62 = vld [vmem:[#allocation2 + $0x20] sm:$0xff]  ;;  %v725_v4 = vld [vmem:[#allocation2 + $0x38] sm:$0xff] }
  0x4b   : > { %v718_v0 = vld [vmem:[#allocation2] sm:$0xff]  ;;  %v721_v6 = vld [vmem:[#allocation2 + $0x18] sm:$0xff]  ;;  %v723_v10 = vld [vmem:[#allocation2 + $0x28] sm:$0xff] }
  0x4c   : > { %v719_v12 = vld [vmem:[#allocation2 + $0x8] sm:$0xff]  ;;  %v728_v16 = vld [vmem:[#allocation2 + $0x50] sm:$0xff]  ;;  %v726_v21 = vld [vmem:[#allocation2 + $0x40] sm:$0xff] }
  0x4d   : > { %v727_v27 = vld [vmem:[#allocation2 + $0x48] sm:$0xff] }
  0x51   : > { %1791 = vmatmul.mubr.msk.bf16.gmra.mxu0 %vm592_vm2, %v1965_v22 }
  0x52   : > { %1794 = vmatprep.mubr.msk.bf16.mxu0 %vm592_vm2, %v1966_v23 }
  0x59   : > { %1795 = vmatmul.mubr.msk.bf16.gmra.mxu0 %vm592_vm2, %v1967_v24  ;;  %v729_v24 = vld [vmem:[#allocation2 + $0x58] sm:$0xff] }
  0x5a   : > { %1798 = vmatprep.mubr.msk.bf16.mxu0 %vm592_vm2, %v1968_v25 }
  0x61   : > { %1799 = vmatmul.mubr.msk.bf16.gmra.mxu0 %vm592_vm2, %v1969_v26 }
  0x62   : > { %1818 = vmatprep.mubr.bf16.mxu0 %v1974_v28 }
 0x109   : > { %v1788_v29 = vpop.f32.mrf.mxu0 }
 0x10b   : > { %v655_v30 = vpop.f32.mrf.mxu0 }
 0x10d   : > { %v1789_v31 = vpop.f32.mrf.mxu0 }
 0x10e   : > { %v751_v51 = vpack.c.bf16 %v1789_v31, %v1788_v29 }
 0x10f   : > { %v658_v32 = vpop.f32.mrf.mxu0 }
 0x110   : > { %v750_v52 = vpack.c.bf16 %v658_v32, %v655_v30  ;;  %v732_v30 = vld [vmem:[#allocation2 + $0x70] sm:$0xff] }
 0x111   : > { %v1792_v33 = vpop.f32.mrf.mxu0 }
 0x113   : > { %v671_v34 = vpop.f32.mrf.mxu0 }
 0x115   : > { %v1793_v35 = vpop.f32.mrf.mxu0 }
 0x116   : > { %v753_v49 = vpack.c.bf16 %v1793_v35, %v1792_v33  ;;  %v730_v33 = vld [vmem:[#allocation2 + $0x60] sm:$0xff] }
 0x117   : > { %v674_v36 = vpop.f32.mrf.mxu0 }
 0x118   : > { %v752_v50 = vpack.c.bf16 %v674_v36, %v671_v34  ;;  %v733_v36 = vld [vmem:[#allocation2 + $0x78] sm:$0xff] }
 0x119   : > { %v1796_v37 = vpop.f32.mrf.mxu0 }
 0x11b   : > { %v687_v38 = vpop.f32.mrf.mxu0 }
 0x11d   : > { %v1797_v39 = vpop.f32.mrf.mxu0 }
 0x11e   : > { %v755_v47 = vpack.c.bf16 %v1797_v39, %v1796_v37  ;;  %v731_v39 = vld [vmem:[#allocation2 + $0x68] sm:$0xff] }
 0x11f   : > { %v690_v40 = vpop.f32.mrf.mxu0 }
 0x120   : > { %v754_v48 = vpack.c.bf16 %v690_v40, %v687_v38 }
 0x121   : > { %v1800_v41 = vpop.f32.mrf.mxu0 }
 0x123   : > { %v703_v42 = vpop.f32.mrf.mxu0 }
 0x125   : > { %v1801_v43 = vpop.f32.mrf.mxu0 }
 0x126   : > { %v757_v44 = vpack.c.bf16 %v1801_v43, %v1800_v41 }
 0x127   : > { %v706_v45 = vpop.f32.mrf.mxu0 }
 0x128   : > { %v756_v46 = vpack.c.bf16 %v706_v45, %v703_v42  ;;  %1802 = vmatprep.subr.bf16.mxu0 %v757_v44  ;;  %1884 = vmatprep.subr.bf16.mxu1 %v757_v44 }
 0x129   : > { %1803 = vmatpush3.bf16.msra.mxu0 %v757_v44  ;;  %1892 = vmatpush3.bf16.msra.mxu1 %v757_v44 }
 0x12a   : > { %1804 = vmatprep.subr.bf16.mxu0 %v756_v46  ;;  %1885 = vmatprep.subr.bf16.mxu1 %v756_v46 }
 0x12d   : > { %1805 = vmatpush3.bf16.msra.mxu0 %v756_v46  ;;  %1893 = vmatpush3.bf16.msra.mxu1 %v756_v46 }
 0x12e   : > { %1806 = vmatprep.subr.bf16.mxu0 %v755_v47  ;;  %1886 = vmatprep.subr.bf16.mxu1 %v755_v47 }
 0x131   : > { %1807 = vmatpush3.bf16.msra.mxu0 %v755_v47  ;;  %1894 = vmatpush3.bf16.msra.mxu1 %v755_v47 }
 0x132   : > { %1808 = vmatprep.subr.bf16.mxu0 %v754_v48  ;;  %1887 = vmatprep.subr.bf16.mxu1 %v754_v48 }
 0x135   : > { %1809 = vmatpush3.bf16.msra.mxu0 %v754_v48  ;;  %1895 = vmatpush3.bf16.msra.mxu1 %v754_v48 }
 0x136   : > { %1810 = vmatprep.subr.bf16.mxu0 %v753_v49  ;;  %1888 = vmatprep.subr.bf16.mxu1 %v753_v49 }
 0x139   : > { %1811 = vmatpush3.bf16.msra.mxu0 %v753_v49  ;;  %1896 = vmatpush3.bf16.msra.mxu1 %v753_v49 }
 0x13a   : > { %1812 = vmatprep.subr.bf16.mxu0 %v752_v50  ;;  %1889 = vmatprep.subr.bf16.mxu1 %v752_v50 }
 0x13d   : > { %1813 = vmatpush3.bf16.msra.mxu0 %v752_v50  ;;  %1897 = vmatpush3.bf16.msra.mxu1 %v752_v50 }
 0x13e   : > { %1814 = vmatprep.subr.bf16.mxu0 %v751_v51  ;;  %1890 = vmatprep.subr.bf16.mxu1 %v751_v51 }
 0x141   : > { %1815 = vmatpush3.bf16.msra.mxu0 %v751_v51  ;;  %1898 = vmatpush3.bf16.msra.mxu1 %v751_v51 }
 0x142   : > { %1816 = vmatprep.subr.bf16.mxu0 %v750_v52  ;;  %1891 = vmatprep.subr.bf16.mxu1 %v750_v52 }
 0x145   : > { %1817 = vmatpush3.bf16.msra.mxu0 %v750_v52  ;;  %1899 = vmatpush3.bf16.msra.mxu1 %v750_v52 }
 0x148   : > { %1823 = vmatmul.mubr.bf16.vlgmr.msra.gmra.mxu1 %v1971_v53  ;;  %1819 = vmatmul.mubr.bf16.vlgmr.msra.gmra.mxu0 %v1975_v54 }
 0x149   : > { %1826 = vmatprep.mubr.bf16.mxu1 %v1972_v55 }
 0x150   : > { %1827 = vmatmul.mubr.bf16.gmra.mxu1 %v1973_v56 }
 0x151   : > { %1830 = vmatprep.mubr.bf16.mxu1 %v1976_v57 }
 0x158   : > { %1831 = vmatmul.mubr.bf16.gmra.mxu1 %v1977_v58 }
 0x208   : > { %v1824_v61 = vpop.f32.mrf.mxu1  ;;  %v1820_v63 = vpop.f32.mrf.mxu0 }
 0x209   : > { %v909_v1 = vadd.f32 %v1824_v61, %v724_v59  ;;  %v905_v2 = vadd.f32 %v1820_v63, %v720_v60 }
 0x20a   : > { %v856_v3 = vpop.f32.mrf.mxu1  ;;  %v840_v5 = vpop.f32.mrf.mxu0 }
 0x20b   : > { %926 = vst.msk [vmem:[#allocation2 + $0x30] sm:$0xff] %vm919_vm3, %v909_v1  ;;  %v907_v7 = vadd.f32 %v856_v3, %v722_v62  ;;  %922 = vst.msk [vmem:[#allocation2 + $0x10] sm:$0xff] %vm919_vm3, %v905_v2  ;;  %v903_v8 = vadd.f32 %v840_v5, %v718_v0 }
 0x20c   : > { %v1825_v9 = vpop.f32.mrf.mxu1  ;;  %v1821_v11 = vpop.f32.mrf.mxu0 }
 0x20d   : > { %924 = vst.msk [vmem:[#allocation2 + $0x20] sm:$0xff] %vm919_vm3, %v907_v7  ;;  %v910_v13 = vadd.f32 %v1825_v9, %v725_v4  ;;  %920 = vst.msk [vmem:[#allocation2] sm:$0xff] %vm919_vm3, %v903_v8  ;;  %v906_v14 = vadd.f32 %v1821_v11, %v721_v6 }
 0x20e   : > { %v859_v15 = vpop.f32.mrf.mxu1  ;;  %v843_v17 = vpop.f32.mrf.mxu0 }
 0x20f   : > { %927 = vst.msk [vmem:[#allocation2 + $0x38] sm:$0xff] %vm919_vm3, %v910_v13  ;;  %v908_v18 = vadd.f32 %v859_v15, %v723_v10  ;;  %923 = vst.msk [vmem:[#allocation2 + $0x18] sm:$0xff] %vm919_vm3, %v906_v14  ;;  %v904_v19 = vadd.f32 %v843_v17, %v719_v12 }
 0x210   : > { %v1828_v20 = vpop.f32.mrf.mxu1 }
 0x211   : > { %925 = vst.msk [vmem:[#allocation2 + $0x28] sm:$0xff] %vm919_vm3, %v908_v18  ;;  %v913_v22 = vadd.f32 %v1828_v20, %v728_v16  ;;  %921 = vst.msk [vmem:[#allocation2 + $0x8] sm:$0xff] %vm919_vm3, %v904_v19 }
 0x212   : > { %v872_v23 = vpop.f32.mrf.mxu1 }
 0x213   : > { %930 = vst.msk [vmem:[#allocation2 + $0x50] sm:$0xff] %vm919_vm3, %v913_v22  ;;  %v911_v25 = vadd.f32 %v872_v23, %v726_v21 }
 0x214   : > { %v1829_v26 = vpop.f32.mrf.mxu1 }
 0x215   : > { %928 = vst.msk [vmem:[#allocation2 + $0x40] sm:$0xff] %vm919_vm3, %v911_v25  ;;  %v914_v28 = vadd.f32 %v1829_v26, %v729_v24 }
 0x216   : > { %v875_v29 = vpop.f32.mrf.mxu1 }
 0x217   : > { %931 = vst.msk [vmem:[#allocation2 + $0x58] sm:$0xff] %vm919_vm3, %v914_v28  ;;  %v912_v31 = vadd.f32 %v875_v29, %v727_v27 }
 0x218   : > { %v1832_v32 = vpop.f32.mrf.mxu1 }
 0x219   : > { %929 = vst.msk [vmem:[#allocation2 + $0x48] sm:$0xff] %vm919_vm3, %v912_v31  ;;  %v917_v34 = vadd.f32 %v1832_v32, %v732_v30 }
 0x21a   : > { %v888_v35 = vpop.f32.mrf.mxu1 }
 0x21b   : > { %934 = vst.msk [vmem:[#allocation2 + $0x70] sm:$0xff] %vm919_vm3, %v917_v34  ;;  %v915_v37 = vadd.f32 %v888_v35, %v730_v33 }
 0x21c   : > { %v1833_v38 = vpop.f32.mrf.mxu1 }
 0x21d   : > { %932 = vst.msk [vmem:[#allocation2 + $0x60] sm:$0xff] %vm919_vm3, %v915_v37  ;;  %v918_v40 = vadd.f32 %v1833_v38, %v733_v36  ;;  %939 = sbr.rel (%p1668_p13) target bundleno = 974 (0x3ce), region = 101 }
 0x21e   : > { %v891_v41 = vpop.f32.mrf.mxu1 }
 0x21f   : > { %935 = vst.msk [vmem:[#allocation2 + $0x78] sm:$0xff] %vm919_vm3, %v918_v40  ;;  %v916_v42 = vadd.f32 %v891_v41, %v731_v39 }
 0x221   : > { %933 = vst.msk [vmem:[#allocation2 + $0x68] sm:$0xff] %vm919_vm3, %v916_v42 }
 0x222   : > { %v997_v43 = vld [vmem:[%s2421_s5] sm:$0xf]  ;;  %v2036_v45 = vmov 0.0   ;;  %vm2037_vm4 = vmmov 0   ;;  %v2038_v47 = vmov 0   ;;  %v941_v51 = vld [vmem:[#allocation2 + $0x8] sm:$0xff] }
 0x223   : > { %v995_v44 = vld [vmem:[%s2422_s6] sm:$0x3]  ;;  %1834 = vmatprep.subr.bf16.mxu0 %v2036_v45  ;;  %v1002_v46 = vsel %vm617_vm1, %v997_v43, 0  ;;  %1836 = vmatprep.mubr.msk.bf16.mxu0 %vm2037_vm4, %v2036_v45  ;;  %v942_v53 = vld [vmem:[#allocation2 + $0x10] sm:$0xff]  ;;  %v943_v54 = vld [vmem:[#allocation2 + $0x18] sm:$0xff]  ;;  %vm1086_vm5 = vcmask 31744  }
 0x224   : > { %1835 = vmatpush3.bf16.msra.mxu0 %v1002_v46  ;;  %v996_v48 = vmax.bf16 %v2038_v47, %v995_v44  ;;  %v1978_v49 = vld [vmem:[%s2420_s4] sm:$0xff]   ;;  %v945_v2 = vld [vmem:[#allocation2 + $0x28] sm:$0xff]  ;;  %v946_v5 = vld [vmem:[#allocation2 + $0x30] sm:$0xff]  ;;  %vm1474_vm6 = vcmask 60416  }
 0x225   : > { %v940_v50 = vld [vmem:[#allocation2] sm:$0xff]  ;;  %1866 = vmatprep.subr.bf16.mxu0 %v1978_v49  ;;  %v947_v6 = vld [vmem:[#allocation2 + $0x38] sm:$0xff]  ;;  %v949_v17 = vld [vmem:[#allocation2 + $0x48] sm:$0xff] }
 0x226   : > { %v2270_v52 = vld [vmem:[%s2419_s3] ss:$0 sm:$0xff]  ;;  %v950_v20 = vld [vmem:[#allocation2 + $0x50] sm:$0xff]  ;;  %v951_v21 = vld [vmem:[#allocation2 + $0x58] sm:$0xff] }
 0x227   : > { %v963_v55 = vadd.f32 %v2270_v52, %v940_v50  ;;  %v964_v56 = vadd.f32 %v2270_v52, %v941_v51  ;;  %v965_v57 = vadd.f32 %v2270_v52, %v942_v53  ;;  %v966_v58 = vadd.f32 %v2270_v52, %v943_v54  ;;  %1837 = vmatmul.mubr.msk.bf16.vlgmr.msra.gmra.mxu0 %vm592_vm2, %v996_v48  ;;  %v944_v1 = vld [vmem:[#allocation2 + $0x20] sm:$0xff]  ;;  %v954_v34 = vld [vmem:[#allocation2 + $0x70] sm:$0xff]  ;;  %v955_v35 = vld [vmem:[#allocation2 + $0x78] sm:$0xff] }
 0x228   : > { %1867 = vmatpush3.bf16.msra.mxu0 %v1978_v49  ;;  %v967_v3 = vadd.f32 %v2270_v52, %v944_v1  ;;  %v968_v4 = vadd.f32 %v2270_v52, %v945_v2  ;;  %v969_v7 = vadd.f32 %v2270_v52, %v946_v5  ;;  %v970_v8 = vadd.f32 %v2270_v52, %v947_v6  ;;  %v1070_v11 = vld [vmem:[%s2180_s17] sm:$0xff]  ;;  %v953_v31 = vld [vmem:[#allocation2 + $0x68] sm:$0xff]  ;;  %v1072_v46 = vld [vmem:[%s2180_s17 + $0x10] sm:$0xff] }
 0x229   : > { %979 = vst.msk [vmem:[%s2185_s12] sm:$0xff] %vm919_vm3, %v963_v55  ;;  %980 = vst.msk [vmem:[%s2185_s12 + $0x8] sm:$0xff] %vm919_vm3, %v964_v56  ;;  %v1044_v59 = vmax.f32 %v963_v55, 0.0  ;;  %v1045_v60 = vmax.f32 %v964_v56, 0.0  ;;  %v1046_v61 = vmax.f32 %v965_v57, 0.0  ;;  %v1047_v62 = vmax.f32 %v966_v58, 0.0  ;;  %1842 = vmatprep.mubr.msk.f32.mxu1 %vm1086_vm5, %v1070_v11 }
 0x22a   : > { %981 = vst.msk [vmem:[%s2185_s12 + $0x10] sm:$0xff] %vm919_vm3, %v965_v57  ;;  %982 = vst.msk [vmem:[%s2185_s12 + $0x18] sm:$0xff] %vm919_vm3, %v966_v58  ;;  %v1048_v9 = vmax.f32 %v967_v3, 0.0  ;;  %v1049_v10 = vmax.f32 %v968_v4, 0.0  ;;  %v1050_v12 = vmax.f32 %v969_v7, 0.0  ;;  %v1051_v13 = vmax.f32 %v970_v8, 0.0 }
 0x22b   : > { %v1060_v63 = vpack.c.bf16 %v1045_v60, %v1044_v59  ;;  %v1061_v0 = vpack.c.bf16 %v1047_v62, %v1046_v61  ;;  %983 = vst.msk [vmem:[%s2185_s12 + $0x20] sm:$0xff] %vm919_vm3, %v967_v3  ;;  %984 = vst.msk [vmem:[%s2185_s12 + $0x28] sm:$0xff] %vm919_vm3, %v968_v4  ;;  %v948_v16 = vld [vmem:[#allocation2 + $0x40] sm:$0xff]  ;;  %v972_v19 = vadd.f32 %v2270_v52, %v949_v17  ;;  %v1071_v45 = vld [vmem:[%s2180_s17 + $0x8] sm:$0xff] }
 0x22c   : > { %985 = vst.msk [vmem:[%s2185_s12 + $0x30] sm:$0xff] %vm919_vm3, %v969_v7  ;;  %986 = vst.msk [vmem:[%s2185_s12 + $0x38] sm:$0xff] %vm919_vm3, %v970_v8  ;;  %v1062_v14 = vpack.c.bf16 %v1049_v10, %v1048_v9  ;;  %v1063_v15 = vpack.c.bf16 %v1051_v13, %v1050_v12  ;;  %v971_v18 = vadd.f32 %v2270_v52, %v948_v16  ;;  %v952_v30 = vld [vmem:[#allocation2 + $0x60] sm:$0xff]  ;;  %v1073_v49 = vld [vmem:[%s2180_s17 + $0x18] sm:$0xff] }
 0x22d   : > { %1868 = vmatprep.mubr.msk.bf16.mxu0 %vm919_vm3, %v1060_v63  ;;  %v973_v22 = vadd.f32 %v2270_v52, %v950_v20  ;;  %v974_v23 = vadd.f32 %v2270_v52, %v951_v21  ;;  %988 = vst.msk [vmem:[%s2185_s12 + $0x48] sm:$0xff] %vm919_vm3, %v972_v19  ;;  %v1053_v25 = vmax.f32 %v972_v19, 0.0  ;;  %v975_v32 = vadd.f32 %v2270_v52, %v952_v30  ;;  %v1074_v50 = vld [vmem:[%s2180_s17 + $0x20] sm:$0xff]  ;;  %v1076_v53 = vld [vmem:[%s2180_s17 + $0x30] sm:$0xff]  ;;  %v1077_v54 = vld [vmem:[%s2180_s17 + $0x38] sm:$0xff] }
 0x22e   : > { %987 = vst.msk [vmem:[%s2185_s12 + $0x40] sm:$0xff] %vm919_vm3, %v971_v18  ;;  %v1052_v24 = vmax.f32 %v971_v18, 0.0  ;;  %v976_v33 = vadd.f32 %v2270_v52, %v953_v31  ;;  %v977_v36 = vadd.f32 %v2270_v52, %v954_v34  ;;  %v978_v37 = vadd.f32 %v2270_v52, %v955_v35  ;;  %v1075_v52 = vld [vmem:[%s2180_s17 + $0x28] sm:$0xff]  ;;  %v1078_v55 = vld [vmem:[%s2180_s17 + $0x40] sm:$0xff]  ;;  %v1080_v57 = vld [vmem:[%s2180_s17 + $0x50] sm:$0xff] }
 0x22f   : > { %1869 = vmatmul.mubr.msk.bf16.vlgmr.msra.gmra.mxu0 %vm919_vm3, %v1061_v0  ;;  %989 = vst.msk [vmem:[%s2185_s12 + $0x50] sm:$0xff] %vm919_vm3, %v973_v22  ;;  %990 = vst.msk [vmem:[%s2185_s12 + $0x58] sm:$0xff] %vm919_vm3, %v974_v23  ;;  %v1054_v26 = vmax.f32 %v973_v22, 0.0  ;;  %v1055_v27 = vmax.f32 %v974_v23, 0.0  ;;  %v1056_v38 = vmax.f32 %v975_v32, 0.0  ;;  %v1079_v56 = vld [vmem:[%s2180_s17 + $0x48] sm:$0xff] }
 0x230   : > { %1872 = vmatprep.mubr.msk.bf16.mxu0 %vm919_vm3, %v1062_v14  ;;  %v1064_v28 = vpack.c.bf16 %v1053_v25, %v1052_v24  ;;  %991 = vst.msk [vmem:[%s2185_s12 + $0x60] sm:$0xff] %vm919_vm3, %v975_v32  ;;  %992 = vst.msk [vmem:[%s2185_s12 + $0x68] sm:$0xff] %vm919_vm3, %v976_v33  ;;  %v1057_v39 = vmax.f32 %v976_v33, 0.0  ;;  %v1058_v40 = vmax.f32 %v977_v36, 0.0  ;;  %v1059_v41 = vmax.f32 %v978_v37, 0.0  ;;  %v1081_v58 = vld [vmem:[%s2180_s17 + $0x58] sm:$0xff] }
 0x231   : > { %v1065_v29 = vpack.c.bf16 %v1055_v27, %v1054_v26  ;;  %993 = vst.msk [vmem:[%s2185_s12 + $0x70] sm:$0xff] %vm919_vm3, %v977_v36  ;;  %994 = vst.msk [vmem:[%s2185_s12 + $0x78] sm:$0xff] %vm919_vm3, %v978_v37  ;;  %v1082_v59 = vld [vmem:[%s2180_s17 + $0x60] sm:$0xff]  ;;  %v1083_v60 = vld [vmem:[%s2180_s17 + $0x68] sm:$0xff] }
 0x232   : > { %v1066_v42 = vpack.c.bf16 %v1057_v39, %v1056_v38  ;;  %v1067_v43 = vpack.c.bf16 %v1059_v41, %v1058_v40  ;;  %v1084_v61 = vld [vmem:[%s2180_s17 + $0x70] sm:$0xff]  ;;  %v1085_v62 = vld [vmem:[%s2180_s17 + $0x78] sm:$0xff] }
 0x237   : > { %1873 = vmatmul.mubr.msk.bf16.gmra.mxu0 %vm919_vm3, %v1063_v15 }
 0x238   : > { %1876 = vmatprep.mubr.msk.bf16.mxu0 %vm919_vm3, %v1064_v28 }
 0x23f   : > { %1877 = vmatmul.mubr.msk.bf16.gmra.mxu0 %vm919_vm3, %v1065_v29 }
 0x240   : > { %1880 = vmatprep.mubr.msk.bf16.mxu0 %vm919_vm3, %v1066_v42 }
 0x247   : > { %1881 = vmatmul.mubr.msk.bf16.gmra.mxu0 %vm919_vm3, %v1067_v43 }
 0x2e7   : > { %v1038_v44 = vpop.f32.mrf.mxu0 }
 0x2e8   : > { %1840 = vmatprep.subr.msk.mxu1 %vm617_vm1, %v1038_v44 }
 0x2e9   : > { %v1838_v47 = vpop.f32.mrf.mxu0  ;;  %1841 = vmatpush3.msk.msra.mxu1 %vm617_vm1, %v1038_v44 }
 0x2ea   : > { %1843 = vmatmul.mubr.msk.f32.vlgmr.msra.gmra.mxu1 %vm1086_vm5, %v1071_v45 }
 0x2eb   : > { %v1041_v48 = vpop.f32.mrf.mxu0  ;;  %1845 = vmatprep.mubr.msk.f32.mxu1 %vm1086_vm5, %v1072_v46 }
 0x2ed   : > { %v1839_v51 = vpop.f32.mrf.mxu0 }
 0x2ee   : > { %1846 = vmatmul.mubr.msk.f32.gmra.mxu1 %vm1086_vm5, %v1073_v49 }
 0x2ef   : > { %1848 = vmatprep.mubr.msk.f32.mxu1 %vm1086_vm5, %v1074_v50  ;;  %v1870_v63 = vpop.f32.mrf.mxu0 }
 0x2f1   : > { %v1347_v0 = vpop.f32.mrf.mxu0 }
 0x2f2   : > { %1849 = vmatmul.mubr.msk.f32.gmra.mxu1 %vm1086_vm5, %v1075_v52 }
 0x2f3   : > { %1851 = vmatprep.mubr.msk.f32.mxu1 %vm1086_vm5, %v1076_v53  ;;  %v1871_v1 = vpop.f32.mrf.mxu0 }
 0x2f5   : > { %v1350_v2 = vpop.f32.mrf.mxu0 }
 0x2f6   : > { %1852 = vmatmul.mubr.msk.f32.gmra.mxu1 %vm1086_vm5, %v1077_v54 }
 0x2f7   : > { %1854 = vmatprep.mubr.msk.f32.mxu1 %vm1086_vm5, %v1078_v55  ;;  %v1874_v3 = vpop.f32.mrf.mxu0 }
 0x2f9   : > { %v1363_v4 = vpop.f32.mrf.mxu0 }
 0x2fa   : > { %1855 = vmatmul.mubr.msk.f32.gmra.mxu1 %vm1086_vm5, %v1079_v56 }
 0x2fb   : > { %1857 = vmatprep.mubr.msk.f32.mxu1 %vm1086_vm5, %v1080_v57  ;;  %v1875_v5 = vpop.f32.mrf.mxu0 }
 0x2fd   : > { %v1366_v6 = vpop.f32.mrf.mxu0 }
 0x2fe   : > { %1858 = vmatmul.mubr.msk.f32.gmra.mxu1 %vm1086_vm5, %v1081_v58 }
 0x2ff   : > { %1860 = vmatprep.mubr.msk.f32.mxu1 %vm1086_vm5, %v1082_v59  ;;  %v1878_v7 = vpop.f32.mrf.mxu0 }
 0x301   : > { %v1379_v8 = vpop.f32.mrf.mxu0 }
 0x302   : > { %1861 = vmatmul.mubr.msk.f32.gmra.mxu1 %vm1086_vm5, %v1083_v60 }
 0x303   : > { %1863 = vmatprep.mubr.msk.f32.mxu1 %vm1086_vm5, %v1084_v61  ;;  %v1879_v12 = vpop.f32.mrf.mxu0 }
 0x305   : > { %v1382_v19 = vpop.f32.mrf.mxu0 }
 0x306   : > { %1864 = vmatmul.mubr.msk.f32.gmra.mxu1 %vm1086_vm5, %v1085_v62 }
 0x307   : > { %v1882_v26 = vpop.f32.mrf.mxu0 }
 0x309   : > { %v1395_v33 = vpop.f32.mrf.mxu0 }
 0x30b   : > { %v1883_v40 = vpop.f32.mrf.mxu0 }
 0x30d   : > { %v1398_v47 = vpop.f32.mrf.mxu0 }
 0x3aa   : > { %v1844_v9 = vpop.f32.mrf.mxu1 }
 0x3ab   : > { %v1351_v10 = vadd.f32 %v1844_v9, %v1350_v2 }
 0x3ac   : > { %v1204_v11 = vpop.f32.mrf.mxu1 }
 0x3ad   : > { %v1716_v13 = vpack.c.bf16 %v1351_v10, %v1351_v10  ;;  %v1348_v14 = vadd.f32 %v1347_v0, %v1204_v11 }
 0x3ae   : > { %v1847_v15 = vpop.f32.mrf.mxu1 }
 0x3af   : > { %1476 = vst.msk [vmem:[%s2190_s14 + $0x4] sm:$0xf] %vm1474_vm6, %v1716_v13  ;;  %v1715_v16 = vpack.c.bf16 %v1348_v14, %v1348_v14  ;;  %v1359_v17 = vadd.f32 %v1871_v1, %v1847_v15 }
 0x3b0   : > { %v1214_v18 = vpop.f32.mrf.mxu1 }
 0x3b1   : > { %1475 = vst.msk [vmem:[%s2190_s14] sm:$0xf] %vm1474_vm6, %v1715_v16  ;;  %v1718_v20 = vpack.c.bf16 %v1359_v17, %v1359_v17  ;;  %v1356_v21 = vadd.f32 %v1870_v63, %v1214_v18 }
 0x3b2   : > { %v1850_v22 = vpop.f32.mrf.mxu1 }
 0x3b3   : > { %1478 = vst.msk [vmem:[%s2190_s14 + $0xc] sm:$0xf] %vm1474_vm6, %v1718_v20  ;;  %v1717_v23 = vpack.c.bf16 %v1356_v21, %v1356_v21  ;;  %v1367_v24 = vadd.f32 %v1850_v22, %v1366_v6 }
 0x3b4   : > { %v1224_v25 = vpop.f32.mrf.mxu1 }
 0x3b5   : > { %1477 = vst.msk [vmem:[%s2190_s14 + $0x8] sm:$0xf] %vm1474_vm6, %v1717_v23  ;;  %v1720_v27 = vpack.c.bf16 %v1367_v24, %v1367_v24  ;;  %v1364_v28 = vadd.f32 %v1363_v4, %v1224_v25 }
 0x3b6   : > { %v1853_v29 = vpop.f32.mrf.mxu1 }
 0x3b7   : > { %1480 = vst.msk [vmem:[%s2190_s14 + $0x14] sm:$0xf] %vm1474_vm6, %v1720_v27  ;;  %v1719_v30 = vpack.c.bf16 %v1364_v28, %v1364_v28  ;;  %v1375_v31 = vadd.f32 %v1875_v5, %v1853_v29 }
 0x3b8   : > { %v1234_v32 = vpop.f32.mrf.mxu1 }
 0x3b9   : > { %1479 = vst.msk [vmem:[%s2190_s14 + $0x10] sm:$0xf] %vm1474_vm6, %v1719_v30  ;;  %v1722_v34 = vpack.c.bf16 %v1375_v31, %v1375_v31  ;;  %v1372_v35 = vadd.f32 %v1874_v3, %v1234_v32 }
 0x3ba   : > { %v1856_v36 = vpop.f32.mrf.mxu1 }
 0x3bb   : > { %1482 = vst.msk [vmem:[%s2190_s14 + $0x1c] sm:$0xf] %vm1474_vm6, %v1722_v34  ;;  %v1721_v37 = vpack.c.bf16 %v1372_v35, %v1372_v35  ;;  %v1383_v38 = vadd.f32 %v1856_v36, %v1382_v19 }
 0x3bc   : > { %v1244_v39 = vpop.f32.mrf.mxu1 }
 0x3bd   : > { %1481 = vst.msk [vmem:[%s2190_s14 + $0x18] sm:$0xf] %vm1474_vm6, %v1721_v37  ;;  %v1724_v41 = vpack.c.bf16 %v1383_v38, %v1383_v38  ;;  %v1380_v42 = vadd.f32 %v1379_v8, %v1244_v39 }
 0x3be   : > { %v1859_v43 = vpop.f32.mrf.mxu1 }
 0x3bf   : > { %1484 = vst.msk [vmem:[%s2190_s14 + $0x24] sm:$0xf] %vm1474_vm6, %v1724_v41  ;;  %v1723_v44 = vpack.c.bf16 %v1380_v42, %v1380_v42  ;;  %v1391_v45 = vadd.f32 %v1879_v12, %v1859_v43 }
 0x3c0   : > { %v1254_v46 = vpop.f32.mrf.mxu1 }
 0x3c1   : > { %1483 = vst.msk [vmem:[%s2190_s14 + $0x20] sm:$0xf] %vm1474_vm6, %v1723_v44  ;;  %v1726_v48 = vpack.c.bf16 %v1391_v45, %v1391_v45  ;;  %v1388_v49 = vadd.f32 %v1878_v7, %v1254_v46 }
 0x3c2   : > { %v1862_v50 = vpop.f32.mrf.mxu1 }
 0x3c3   : > { %1486 = vst.msk [vmem:[%s2190_s14 + $0x2c] sm:$0xf] %vm1474_vm6, %v1726_v48  ;;  %v1725_v51 = vpack.c.bf16 %v1388_v49, %v1388_v49  ;;  %v1399_v52 = vadd.f32 %v1862_v50, %v1398_v47 }
 0x3c4   : > { %v1264_v53 = vpop.f32.mrf.mxu1 }
 0x3c5   : > { %1485 = vst.msk [vmem:[%s2190_s14 + $0x28] sm:$0xf] %vm1474_vm6, %v1725_v51  ;;  %v1728_v54 = vpack.c.bf16 %v1399_v52, %v1399_v52  ;;  %v1396_v55 = vadd.f32 %v1395_v33, %v1264_v53 }
 0x3c6   : > { %v1865_v56 = vpop.f32.mrf.mxu1 }
 0x3c7   : > { %1488 = vst.msk [vmem:[%s2190_s14 + $0x34] sm:$0xf] %vm1474_vm6, %v1728_v54  ;;  %v1727_v57 = vpack.c.bf16 %v1396_v55, %v1396_v55  ;;  %v1407_v58 = vadd.f32 %v1883_v40, %v1865_v56 }
 0x3c8   : > { %v1274_v59 = vpop.f32.mrf.mxu1 }
 0x3c9   : > { %1487 = vst.msk [vmem:[%s2190_s14 + $0x30] sm:$0xf] %vm1474_vm6, %v1727_v57  ;;  %v1730_v60 = vpack.c.bf16 %v1407_v58, %v1407_v58  ;;  %v1404_v61 = vadd.f32 %v1882_v26, %v1274_v59 }
 0x3cb   : > { %1490 = vst.msk [vmem:[%s2190_s14 + $0x3c] sm:$0xf] %vm1474_vm6, %v1730_v60  ;;  %v1729_v62 = vpack.c.bf16 %v1404_v61, %v1404_v61 }
 0x3cd   : > { %1489 = vst.msk [vmem:[%s2190_s14 + $0x38] sm:$0xf] %vm1474_vm6, %v1729_v62 }
 0x3ce PF: > { %s20_s15 = sadd.s32 1, %s2033_s15   ;;  %s2434_s12 = sld [smem:[#allocation4_spill]] }
 0x3cf   : > { %p17_p0 = scmp.ge.s32.totalorder %s20_s15, 11   ;;  %s2435_s17 = sld [smem:[#allocation5_spill]] }
 0x3d0   : > { %s2436_s14 = sld [smem:[#allocation6_spill]]  ;;  %s2437_s30 = smov %s2013_s10 }
 0x3d1   : > { %s2438_s10 = smov %s2140_s22  ;;  %s2439_s11 = smov %s2025_s13 }
 0x3d2   :  { %19 = sbr.rel (!%p17_p0) target bundleno = 6 (0x6), region = 154 }
 0x3d5   : > { %s2440_s13 = smov %s2435_s17 }

</bundles_post_ra>
